<compile_context>
chip_gen: v7x
topology: tpu7x:2x2x1
jax: 0.10.0
libtpu: 0.0.40
codegen_flags: <defaults>
</compile_context>

<pallas_src>
import functools
import math

import jax
import jax.numpy as jnp
from jax import lax
from jax.experimental import pallas as pl
from jax.experimental.pallas import tpu as pltpu

_NEG_INF = -1e30  # large finite negative: robust even if a row were fully masked
_VMEM_LIMIT = 32 * 1024 * 1024  # fits v5e/v6e/v7x scoped budgets


def _tile(dim, preferred, unit):
    """Largest multiple of `unit` <= `preferred` that divides `dim`, else `dim`.

    Returned tile is always legal for TPU block shapes: either a multiple of
    `unit` (8 for sublane dims, 128 for lane dims) or the full dimension.
    """
    if dim <= preferred or dim % unit != 0:
        return dim
    t = (min(preferred, dim) // unit) * unit
    while t >= unit:
        if dim % t == 0:
            return t
        t -= unit
    return dim


# ----------------------------------------------------------------------------
# Kernel 1: fused per-head QKV projection
#   x:[B,T,C], wq/wk/wv:[H,C,hd], bq/bk/bv:[H,1,hd] -> q,k,v:[B,H,T,hd]
# ----------------------------------------------------------------------------
def _qkv_proj_kernel(x_ref, wq_ref, wk_ref, wv_ref, bq_ref, bk_ref, bv_ref,
                     q_ref, k_ref, v_ref, q_acc, k_acc, v_acc):
    ki = pl.program_id(3)

    @pl.when(ki == 0)
    def _init():
        q_acc[...] = jnp.zeros_like(q_acc)
        k_acc[...] = jnp.zeros_like(k_acc)
        v_acc[...] = jnp.zeros_like(v_acc)

    x = x_ref[...]                                          # [tt, tk], input dtype
    q_acc[...] += jnp.dot(x, wq_ref[...], preferred_element_type=jnp.float32)
    k_acc[...] += jnp.dot(x, wk_ref[...], preferred_element_type=jnp.float32)
    v_acc[...] += jnp.dot(x, wv_ref[...], preferred_element_type=jnp.float32)

    @pl.when(ki == pl.num_programs(3) - 1)
    def _finalize():
        q_ref[...] = (q_acc[...] + bq_ref[...].astype(jnp.float32)).astype(q_ref.dtype)
        k_ref[...] = (k_acc[...] + bk_ref[...].astype(jnp.float32)).astype(k_ref.dtype)
        v_ref[...] = (v_acc[...] + bv_ref[...].astype(jnp.float32)).astype(v_ref.dtype)


def qkv_projection(x, wq, wk, wv, bq, bk, bv, *, block_t=256, block_k=512):
    B, T, C = x.shape
    H, _, hd = wq.shape
    tt = _tile(T, block_t, 8)
    tk = _tile(C, block_k, 128)
    grid = (B, H, T // tt, C // tk)

    x_spec = pl.BlockSpec((None, tt, tk), lambda b, h, ti, ki: (b, ti, ki))
    w_spec = pl.BlockSpec((None, tk, hd), lambda b, h, ti, ki: (h, ki, 0))
    b_spec = pl.BlockSpec((None, 1, hd), lambda b, h, ti, ki: (h, 0, 0))
    o_spec = pl.BlockSpec((None, None, tt, hd), lambda b, h, ti, ki: (b, h, ti, 0))
    out_sh = jax.ShapeDtypeStruct((B, H, T, hd), x.dtype)

    return pl.pallas_call(
        _qkv_proj_kernel,
        out_shape=(out_sh, out_sh, out_sh),
        grid=grid,
        in_specs=[x_spec, w_spec, w_spec, w_spec, b_spec, b_spec, b_spec],
        out_specs=(o_spec, o_spec, o_spec),
        scratch_shapes=[pltpu.VMEM((tt, hd), jnp.float32) for _ in range(3)],
        compiler_params=pltpu.CompilerParams(
            dimension_semantics=("parallel", "parallel", "parallel", "arbitrary"),
            vmem_limit_bytes=_VMEM_LIMIT,
        ),
    )(x, wq, wk, wv, bq, bk, bv)


# ----------------------------------------------------------------------------
# Kernel 2: flash-style causal attention (online softmax, causal tile skipping)
#   q,k,v:[B,H,T,hd] -> y:[B,H,T,hd]
# ----------------------------------------------------------------------------
def _flash_attn_kernel(q_ref, k_ref, v_ref, o_ref, m_ref, l_ref, acc_ref, *, scale):
    qi = pl.program_id(2)
    ki = pl.program_id(3)

    @pl.when(ki == 0)
    def _init():
        m_ref[...] = jnp.full_like(m_ref, _NEG_INF)
        l_ref[...] = jnp.zeros_like(l_ref)
        acc_ref[...] = jnp.zeros_like(acc_ref)

    def _accumulate(apply_mask):
        # Fold 1/sqrt(hd) into q ([tq,hd] mul, native dtype -> bf16 MXU path
        # stays bf16; the weak-typed python scalar does not promote dtype).
        q = q_ref[...] * scale                               # [tq, hd]
        k = k_ref[...]                                       # [tkv, hd]
        # Contract over hd without transposing K (no XLU transpose).
        s = lax.dot_general(q, k, (((1,), (1,)), ((), ())),
                            preferred_element_type=jnp.float32)   # [tq, tkv] f32
        if apply_mask:  # static: only traced for the diagonal-tile branch
            r = lax.broadcasted_iota(jnp.int32, s.shape, 0)
            c = lax.broadcasted_iota(jnp.int32, s.shape, 1)
            s = jnp.where(r >= c, s, _NEG_INF)

        m_prev = m_ref[...]
        m_new = jnp.maximum(m_prev, jnp.max(s, axis=-1, keepdims=True))
        alpha = jnp.exp(m_prev - m_new)
        p = jnp.exp(s - m_new)
        l_ref[...] = alpha * l_ref[...] + jnp.sum(p, axis=-1, keepdims=True)
        acc_ref[...] = alpha * acc_ref[...] + jnp.dot(
            p.astype(v_ref.dtype), v_ref[...], preferred_element_type=jnp.float32)
        m_ref[...] = m_new

    # KV tiles strictly below the diagonal: no mask needed.
    @pl.when(ki < qi)
    def _off_diag():
        _accumulate(apply_mask=False)

    # Diagonal tile (tq == tkv, aligned): apply the causal mask here only.
    @pl.when(ki == qi)
    def _diag():
        _accumulate(apply_mask=True)

    # ki > qi tiles are skipped entirely; their K/V DMA is suppressed by the
    # clamped index_map in the wrapper.

    @pl.when(ki == pl.num_programs(3) - 1)
    def _finalize():
        inv_l = pl.reciprocal(l_ref[...], approx=True)      # EUP, not a divide
        o_ref[...] = (acc_ref[...] * inv_l).astype(o_ref.dtype)


def flash_attention(q, k, v, *, block_q=128):
    B, H, T, hd = q.shape
    tq = _tile(T, block_q, 8)
    tkv = tq  # causal tile skipping assumes equal, aligned q/kv tiles
    nq, nkv = T // tq, T // tkv
    scale = 1.0 / math.sqrt(hd)

    q_spec = pl.BlockSpec((None, None, tq, hd), lambda b, h, qi, ki: (b, h, qi, 0))
    # Clamp the KV block index so skipped (above-diagonal) steps re-use the
    # already-resident tile and issue no DMA.
    kv_spec = pl.BlockSpec((None, None, tkv, hd),
                           lambda b, h, qi, ki: (b, h, jnp.minimum(ki, qi), 0))
    o_spec = pl.BlockSpec((None, None, tq, hd), lambda b, h, qi, ki: (b, h, qi, 0))

    cost = pl.CostEstimate(
        flops=2 * B * H * T * T * hd,            # QK^T + PV, causal-halved
        transcendentals=B * H * T * T // 2,
        bytes_accessed=q.dtype.itemsize * (q.size + k.size + v.size + q.size),
    )

    return pl.pallas_call(
        functools.partial(_flash_attn_kernel, scale=scale),
        out_shape=jax.ShapeDtypeStruct((B, H, T, hd), q.dtype),
        grid=(B, H, nq, nkv),
        in_specs=[q_spec, kv_spec, kv_spec],
        out_specs=o_spec,
        scratch_shapes=[
            pltpu.VMEM((tq, 1), jnp.float32),    # running max
            pltpu.VMEM((tq, 1), jnp.float32),    # running sum
            pltpu.VMEM((tq, hd), jnp.float32),   # output accumulator
        ],
        compiler_params=pltpu.CompilerParams(
            dimension_semantics=("parallel", "parallel", "parallel", "arbitrary"),
            vmem_limit_bytes=_VMEM_LIMIT,
        ),
        cost_estimate=cost,
    )(q, k, v)


# ----------------------------------------------------------------------------
# Kernel 3: output projection as a sum over heads (consumes [B,H,T,hd] directly)
#   y:[B,H,T,hd], w:[H,hd,C], b:[1,C] -> out:[B,T,C]
# ----------------------------------------------------------------------------
def _head_proj_kernel(y_ref, w_ref, b_ref, o_ref, acc_ref):
    h = pl.program_id(3)

    @pl.when(h == 0)
    def _init():
        acc_ref[...] = jnp.zeros_like(acc_ref)

    acc_ref[...] += jnp.dot(y_ref[...], w_ref[...],
                            preferred_element_type=jnp.float32)

    @pl.when(h == pl.num_programs(3) - 1)
    def _finalize():
        o_ref[...] = (acc_ref[...] + b_ref[...].astype(jnp.float32)).astype(o_ref.dtype)


def head_projection(y, w, b, *, block_t=256, block_n=512):
    B, H, T, hd = y.shape
    C = w.shape[-1]
    tt = _tile(T, block_t, 8)
    tn = _tile(C, block_n, 128)
    grid = (B, T // tt, C // tn, H)

    y_spec = pl.BlockSpec((None, None, tt, hd), lambda bb, ti, j, h: (bb, h, ti, 0))
    w_spec = pl.BlockSpec((None, hd, tn), lambda bb, ti, j, h: (h, 0, j))
    b_spec = pl.BlockSpec((1, tn), lambda bb, ti, j, h: (0, j))
    o_spec = pl.BlockSpec((None, tt, tn), lambda bb, ti, j, h: (bb, ti, j))

    return pl.pallas_call(
        _head_proj_kernel,
        out_shape=jax.ShapeDtypeStruct((B, T, C), y.dtype),
        grid=grid,
        in_specs=[y_spec, w_spec, b_spec],
        out_specs=o_spec,
        scratch_shapes=[pltpu.VMEM((tt, tn), jnp.float32)],
        compiler_params=pltpu.CompilerParams(
            dimension_semantics=("parallel", "parallel", "parallel", "arbitrary"),
            vmem_limit_bytes=_VMEM_LIMIT,
        ),
    )(y, w, b)


# ----------------------------------------------------------------------------
# Full module forward
# ----------------------------------------------------------------------------
def causal_self_attention(x, params, n_head, *,
                          block_q=128, block_t=256, block_k=512, block_n=512):
    """x: [B, T, C] -> [B, T, C]. Mirrors CausalSelfAttention.forward (eval)."""
    B, T, C = x.shape
    H = n_head
    hd = C // H

    w_attn, b_attn = params["w_attn"], params["b_attn"]   # [C,3C], [3C]
    w_proj, b_proj = params["w_proj"], params["b_proj"]   # [C,C],  [C]

    # One-time per-head weight relayouts ([C,C]-sized, could be precomputed).
    def per_head(w2d):  # [C, C] -> [H, C, hd]
        return jnp.transpose(w2d.reshape(C, H, hd), (1, 0, 2))

    wq = per_head(w_attn[:, 0 * C:1 * C])
    wk = per_head(w_attn[:, 1 * C:2 * C])
    wv = per_head(w_attn[:, 2 * C:3 * C])
    bq = b_attn[0 * C:1 * C].reshape(H, 1, hd)
    bk = b_attn[1 * C:2 * C].reshape(H, 1, hd)
    bv = b_attn[2 * C:3 * C].reshape(H, 1, hd)

    q, k, v = qkv_projection(x, wq, wk, wv, bq, bk, bv,
                             block_t=block_t, block_k=block_k)  # each [B,H,T,hd]
    y = flash_attention(q, k, v, block_q=block_q)               # [B,H,T,hd]

    wp = w_proj.reshape(H, hd, C)                               # free reshape
    bp = b_proj.reshape(1, C)
    out = head_projection(y, wp, bp, block_t=block_t, block_n=block_n)  # [B,T,C]
    # TODO(synk): attn_dropout / resid_dropout are identity in eval mode (p=0).
    return out


# ----------------------------------------------------------------------------
# Pure-JAX reference (for correctness check) and synthetic param init
# ----------------------------------------------------------------------------
def reference(x, params, n_head):
    B, T, C = x.shape
    hd = C // n_head
    qkv = x @ params["w_attn"] + params["b_attn"]
    q, k, v = jnp.split(qkv, 3, axis=-1)

    def heads(t):
        return jnp.transpose(t.reshape(B, T, n_head, hd), (0, 2, 1, 3))

    q, k, v = heads(q), heads(k), heads(v)
    s = (q @ jnp.swapaxes(k, -1, -2)) * (1.0 / math.sqrt(hd))
    mask = jnp.tril(jnp.ones((T, T), dtype=bool))
    s = jnp.where(mask, s, -jnp.inf)
    p = jax.nn.softmax(s, axis=-1)
    y = p @ v
    y = jnp.transpose(y, (0, 2, 1, 3)).reshape(B, T, C)
    return y @ params["w_proj"] + params["b_proj"]


def init_params(key, n_embd):
    k1, k2, k3, k4 = jax.random.split(key, 4)
    scale = 0.02
    return {
        # stored as [in, out] (transposed vs. PyTorch's [out, in])
        "w_attn": scale * jax.random.normal(k1, (n_embd, 3 * n_embd), jnp.float32),
        "b_attn": scale * jax.random.normal(k2, (3 * n_embd,), jnp.float32),
        "w_proj": scale * jax.random.normal(k3, (n_embd, n_embd), jnp.float32),
        "b_proj": scale * jax.random.normal(k4, (n_embd,), jnp.float32),
    }


def _check(B, T, C, H, key, **blocks):
    kx, kp = jax.random.split(key)
    x = jax.random.normal(kx, (B, T, C), jnp.float32)
    params = init_params(kp, C)

    y = causal_self_attention(x, params, n_head=H, **blocks)
    jax.block_until_ready(y)

    assert y.shape == (B, T, C) and y.dtype == jnp.float32
    y_ref = reference(x, params, n_head=H)
    err = float(jnp.max(jnp.abs(y - y_ref)))
    assert err < 2e-3, f"max abs err {err} at shape {(B, T, C, H)}"


if __name__ == "__main__":
    key = jax.random.PRNGKey(0)
    k1, k2 = jax.random.split(key)

    # Small config: batch=2, seq=8, n_embd=32, n_head=4 (head_dim=8).
    _check(2, 8, 32, 4, k1)

    # Slightly larger config that exercises the multi-tile paths:
    # causal KV-tile skipping, online-softmax accumulation, K-reduction and
    # head-reduction grid axes (still tiny: ~128 KiB of activations).
    _check(1, 128, 256, 4, k2, block_q=64, block_t=64, block_k=128, block_n=128)

    print("KERNEL_OK")
</pallas_src>

<mosaic_0001>
module attributes {stable_mosaic.version = 11 : i64} {
  func.func @_qkv_proj_kernel(%arg0: i32, %arg1: i32, %arg2: i32, %arg3: i32, %arg4: memref<1x8x32xf32, #tpu.memory_space<vmem>>, %arg5: memref<1x32x8xf32, #tpu.memory_space<vmem>>, %arg6: memref<1x32x8xf32, #tpu.memory_space<vmem>>, %arg7: memref<1x32x8xf32, #tpu.memory_space<vmem>>, %arg8: memref<1x1x8xf32, #tpu.memory_space<vmem>>, %arg9: memref<1x1x8xf32, #tpu.memory_space<vmem>>, %arg10: memref<1x1x8xf32, #tpu.memory_space<vmem>>, %arg11: memref<1x1x8x8xf32, #tpu.memory_space<vmem>>, %arg12: memref<1x1x8x8xf32, #tpu.memory_space<vmem>>, %arg13: memref<1x1x8x8xf32, #tpu.memory_space<vmem>>, %arg14: memref<8x8xf32, #tpu.memory_space<vmem>>, %arg15: memref<8x8xf32, #tpu.memory_space<vmem>>, %arg16: memref<8x8xf32, #tpu.memory_space<vmem>>) attributes {dimension_semantics = [#tpu.dimension_semantics<parallel>, #tpu.dimension_semantics<parallel>, #tpu.dimension_semantics<parallel>, #tpu.dimension_semantics<arbitrary>], iteration_bounds = array<i64: 2, 4, 1, 1>, scalar_prefetch = 0 : i64, scratch_operands = 3 : i64, tpu.core_type = #tpu.core_type<tc>, window_params = [{transform_indices = @transform_0, window_bounds = array<i64: 1, 8, 32>}, {transform_indices = @transform_1, window_bounds = array<i64: 1, 32, 8>}, {transform_indices = @transform_2, window_bounds = array<i64: 1, 32, 8>}, {transform_indices = @transform_3, window_bounds = array<i64: 1, 32, 8>}, {transform_indices = @transform_4, window_bounds = array<i64: 1, 1, 8>}, {transform_indices = @transform_5, window_bounds = array<i64: 1, 1, 8>}, {transform_indices = @transform_6, window_bounds = array<i64: 1, 1, 8>}, {transform_indices = @transform_7, window_bounds = array<i64: 1, 1, 8, 8>}, {transform_indices = @transform_8, window_bounds = array<i64: 1, 1, 8, 8>}, {transform_indices = @transform_9, window_bounds = array<i64: 1, 1, 8, 8>}]} {
    %c0_i32 = arith.constant 0 : i32
    %0 = arith.cmpi eq, %arg3, %c0_i32 : i32
    %1 = arith.extui %0 : i1 to i32
    %c0_i32_0 = arith.constant 0 : i32
    %2 = arith.cmpi ne, %1, %c0_i32_0 : i32
    scf.if %2 {
      %cst_28 = arith.constant 0.000000e+00 : f32
      %26 = vector.broadcast %cst_28 : f32 to vector<8x8xf32>
      %c0_29 = arith.constant 0 : index
      %c0_30 = arith.constant 0 : index
      %27 = vector.load %arg14[%c0_29, %c0_30] : memref<8x8xf32, #tpu.memory_space<vmem>>, vector<8x8xf32>
      tpu.vector_store %arg14[%c0_29, %c0_30], %26 {strides = array<i32>} : memref<8x8xf32, #tpu.memory_space<vmem>>, vector<8x8xf32>,
      %cst_31 = arith.constant 0.000000e+00 : f32
      %28 = vector.broadcast %cst_31 : f32 to vector<8x8xf32>
      %c0_32 = arith.constant 0 : index
      %c0_33 = arith.constant 0 : index
      %29 = vector.load %arg15[%c0_32, %c0_33] : memref<8x8xf32, #tpu.memory_space<vmem>>, vector<8x8xf32>
      tpu.vector_store %arg15[%c0_32, %c0_33], %28 {strides = array<i32>} : memref<8x8xf32, #tpu.memory_space<vmem>>, vector<8x8xf32>,
      %cst_34 = arith.constant 0.000000e+00 : f32
      %30 = vector.broadcast %cst_34 : f32 to vector<8x8xf32>
      %c0_35 = arith.constant 0 : index
      %c0_36 = arith.constant 0 : index
      %31 = vector.load %arg16[%c0_35, %c0_36] : memref<8x8xf32, #tpu.memory_space<vmem>>, vector<8x8xf32>
      tpu.vector_store %arg16[%c0_35, %c0_36], %30 {strides = array<i32>} : memref<8x8xf32, #tpu.memory_space<vmem>>, vector<8x8xf32>,
    } else {
    }
    %c0 = arith.constant 0 : index
    %c0_1 = arith.constant 0 : index
    %c0_2 = arith.constant 0 : index
    %3 = vector.load %arg4[%c0, %c0_1, %c0_2] : memref<1x8x32xf32, #tpu.memory_space<vmem>>, vector<1x8x32xf32>
    %4 = vector.shape_cast %3 : vector<1x8x32xf32> to vector<8x32xf32>
    %c0_3 = arith.constant 0 : index
    %c0_4 = arith.constant 0 : index
    %5 = vector.load %arg14[%c0_3, %c0_4] : memref<8x8xf32, #tpu.memory_space<vmem>>, vector<8x8xf32>
    %c0_5 = arith.constant 0 : index
    %c0_6 = arith.constant 0 : index
    %c0_7 = arith.constant 0 : index
    %6 = vector.load %arg5[%c0_5, %c0_6, %c0_7] : memref<1x32x8xf32, #tpu.memory_space<vmem>>, vector<1x32x8xf32>
    %7 = vector.shape_cast %6 : vector<1x32x8xf32> to vector<32x8xf32>
    %cst = arith.constant dense<0.000000e+00> : vector<8x8xf32>
    %8 = tpu.matmul %4, %7, %cst {dimension_numbers = #tpu.dot_dimension_numbers<[1], [0], [0], [1], [0, 0, 1, 1], [], []>} : vector<8x32xf32>, vector<32x8xf32>, vector<8x8xf32> -> vector<8x8xf32>
    %9 = arith.addf %5, %8 : vector<8x8xf32>
    %c0_8 = arith.constant 0 : index
    %c0_9 = arith.constant 0 : index
    %10 = vector.load %arg14[%c0_8, %c0_9] : memref<8x8xf32, #tpu.memory_space<vmem>>, vector<8x8xf32>
    tpu.vector_store %arg14[%c0_8, %c0_9], %9 {strides = array<i32>} : memref<8x8xf32, #tpu.memory_space<vmem>>, vector<8x8xf32>,
    %c0_10 = arith.constant 0 : index
    %c0_11 = arith.constant 0 : index
    %11 = vector.load %arg15[%c0_10, %c0_11] : memref<8x8xf32, #tpu.memory_space<vmem>>, vector<8x8xf32>
    %c0_12 = arith.constant 0 : index
    %c0_13 = arith.constant 0 : index
    %c0_14 = arith.constant 0 : index
    %12 = vector.load %arg6[%c0_12, %c0_13, %c0_14] : memref<1x32x8xf32, #tpu.memory_space<vmem>>, vector<1x32x8xf32>
    %13 = vector.shape_cast %12 : vector<1x32x8xf32> to vector<32x8xf32>
    %cst_15 = arith.constant dense<0.000000e+00> : vector<8x8xf32>
    %14 = tpu.matmul %4, %13, %cst_15 {dimension_numbers = #tpu.dot_dimension_numbers<[1], [0], [0], [1], [0, 0, 1, 1], [], []>} : vector<8x32xf32>, vector<32x8xf32>, vector<8x8xf32> -> vector<8x8xf32>
    %15 = arith.addf %11, %14 : vector<8x8xf32>
    %c0_16 = arith.constant 0 : index
    %c0_17 = arith.constant 0 : index
    %16 = vector.load %arg15[%c0_16, %c0_17] : memref<8x8xf32, #tpu.memory_space<vmem>>, vector<8x8xf32>
    tpu.vector_store %arg15[%c0_16, %c0_17], %15 {strides = array<i32>} : memref<8x8xf32, #tpu.memory_space<vmem>>, vector<8x8xf32>,
    %c0_18 = arith.constant 0 : index
    %c0_19 = arith.constant 0 : index
    %17 = vector.load %arg16[%c0_18, %c0_19] : memref<8x8xf32, #tpu.memory_space<vmem>>, vector<8x8xf32>
    %c0_20 = arith.constant 0 : index
    %c0_21 = arith.constant 0 : index
    %c0_22 = arith.constant 0 : index
    %18 = vector.load %arg7[%c0_20, %c0_21, %c0_22] : memref<1x32x8xf32, #tpu.memory_space<vmem>>, vector<1x32x8xf32>
    %19 = vector.shape_cast %18 : vector<1x32x8xf32> to vector<32x8xf32>
    %cst_23 = arith.constant dense<0.000000e+00> : vector<8x8xf32>
    %20 = tpu.matmul %4, %19, %cst_23 {dimension_numbers = #tpu.dot_dimension_numbers<[1], [0], [0], [1], [0, 0, 1, 1], [], []>} : vector<8x32xf32>, vector<32x8xf32>, vector<8x8xf32> -> vector<8x8xf32>
    %21 = arith.addf %17, %20 : vector<8x8xf32>
    %c0_24 = arith.constant 0 : index
    %c0_25 = arith.constant 0 : index
    %22 = vector.load %arg16[%c0_24, %c0_25] : memref<8x8xf32, #tpu.memory_space<vmem>>, vector<8x8xf32>
    tpu.vector_store %arg16[%c0_24, %c0_25], %21 {strides = array<i32>} : memref<8x8xf32, #tpu.memory_space<vmem>>, vector<8x8xf32>,
    %c0_i32_26 = arith.constant 0 : i32
    %23 = arith.cmpi eq, %arg3, %c0_i32_26 : i32
    %24 = arith.extui %23 : i1 to i32
    %c0_i32_27 = arith.constant 0 : i32
    %25 = arith.cmpi ne, %24, %c0_i32_27 : i32
    scf.if %25 {
      %c0_28 = arith.constant 0 : index
      %c0_29 = arith.constant 0 : index
      %26 = vector.load %arg14[%c0_28, %c0_29] : memref<8x8xf32, #tpu.memory_space<vmem>>, vector<8x8xf32>
      %c0_30 = arith.constant 0 : index
      %c0_31 = arith.constant 0 : index
      %c0_32 = arith.constant 0 : index
      %27 = vector.load %arg8[%c0_30, %c0_31, %c0_32] : memref<1x1x8xf32, #tpu.memory_space<vmem>>, vector<1x1x8xf32>
      %28 = vector.shape_cast %27 : vector<1x1x8xf32> to vector<1x8xf32>
      %29 = vector.broadcast %28 : vector<1x8xf32> to vector<8x8xf32>
      %30 = arith.addf %26, %29 : vector<8x8xf32>
      %c0_33 = arith.constant 0 : index
      %c0_34 = arith.constant 0 : index
      %c0_35 = arith.constant 0 : index
      %c0_36 = arith.constant 0 : index
      %31 = vector.load %arg11[%c0_33, %c0_34, %c0_35, %c0_36] : memref<1x1x8x8xf32, #tpu.memory_space<vmem>>, vector<1x1x8x8xf32>
      %32 = vector.shape_cast %31 : vector<1x1x8x8xf32> to vector<8x8xf32>
      %33 = vector.shape_cast %30 : vector<8x8xf32> to vector<1x1x8x8xf32>
      tpu.vector_store %arg11[%c0_33, %c0_34, %c0_35, %c0_36], %33 {strides = array<i32>} : memref<1x1x8x8xf32, #tpu.memory_space<vmem>>, vector<1x1x8x8xf32>,
      %c0_37 = arith.constant 0 : index
      %c0_38 = arith.constant 0 : index
      %34 = vector.load %arg15[%c0_37, %c0_38] : memref<8x8xf32, #tpu.memory_space<vmem>>, vector<8x8xf32>
      %c0_39 = arith.constant 0 : index
      %c0_40 = arith.constant 0 : index
      %c0_41 = arith.constant 0 : index
      %35 = vector.load %arg9[%c0_39, %c0_40, %c0_41] : memref<1x1x8xf32, #tpu.memory_space<vmem>>, vector<1x1x8xf32>
      %36 = vector.shape_cast %35 : vector<1x1x8xf32> to vector<1x8xf32>
      %37 = vector.broadcast %36 : vector<1x8xf32> to vector<8x8xf32>
      %38 = arith.addf %34, %37 : vector<8x8xf32>
      %c0_42 = arith.constant 0 : index
      %c0_43 = arith.constant 0 : index
      %c0_44 = arith.constant 0 : index
      %c0_45 = arith.constant 0 : index
      %39 = vector.load %arg12[%c0_42, %c0_43, %c0_44, %c0_45] : memref<1x1x8x8xf32, #tpu.memory_space<vmem>>, vector<1x1x8x8xf32>
      %40 = vector.shape_cast %39 : vector<1x1x8x8xf32> to vector<8x8xf32>
      %41 = vector.shape_cast %38 : vector<8x8xf32> to vector<1x1x8x8xf32>
      tpu.vector_store %arg12[%c0_42, %c0_43, %c0_44, %c0_45], %41 {strides = array<i32>} : memref<1x1x8x8xf32, #tpu.memory_space<vmem>>, vector<1x1x8x8xf32>,
      %c0_46 = arith.constant 0 : index
      %c0_47 = arith.constant 0 : index
      %42 = vector.load %arg16[%c0_46, %c0_47] : memref<8x8xf32, #tpu.memory_space<vmem>>, vector<8x8xf32>
      %c0_48 = arith.constant 0 : index
      %c0_49 = arith.constant 0 : index
      %c0_50 = arith.constant 0 : index
      %43 = vector.load %arg10[%c0_48, %c0_49, %c0_50] : memref<1x1x8xf32, #tpu.memory_space<vmem>>, vector<1x1x8xf32>
      %44 = vector.shape_cast %43 : vector<1x1x8xf32> to vector<1x8xf32>
      %45 = vector.broadcast %44 : vector<1x8xf32> to vector<8x8xf32>
      %46 = arith.addf %42, %45 : vector<8x8xf32>
      %c0_51 = arith.constant 0 : index
      %c0_52 = arith.constant 0 : index
      %c0_53 = arith.constant 0 : index
      %c0_54 = arith.constant 0 : index
      %47 = vector.load %arg13[%c0_51, %c0_52, %c0_53, %c0_54] : memref<1x1x8x8xf32, #tpu.memory_space<vmem>>, vector<1x1x8x8xf32>
      %48 = vector.shape_cast %47 : vector<1x1x8x8xf32> to vector<8x8xf32>
      %49 = vector.shape_cast %46 : vector<8x8xf32> to vector<1x1x8x8xf32>
      tpu.vector_store %arg13[%c0_51, %c0_52, %c0_53, %c0_54], %49 {strides = array<i32>} : memref<1x1x8x8xf32, #tpu.memory_space<vmem>>, vector<1x1x8x8xf32>,
    } else {
    }
    return
  }
  func.func @transform_0(%arg0: i32, %arg1: i32, %arg2: i32, %arg3: i32) -> (i32, i32, i32) {
    %c0_i32 = arith.constant 0 : i32
    return %arg0, %arg2, %arg3 : i32, i32, i32
  }
  func.func @transform_1(%arg0: i32, %arg1: i32, %arg2: i32, %arg3: i32) -> (i32, i32, i32) {
    %c0_i32 = arith.constant 0 : i32
    %c0_i32_0 = arith.constant 0 : i32
    return %arg1, %arg3, %c0_i32 : i32, i32, i32
  }
  func.func @transform_2(%arg0: i32, %arg1: i32, %arg2: i32, %arg3: i32) -> (i32, i32, i32) {
    %c0_i32 = arith.constant 0 : i32
    %c0_i32_0 = arith.constant 0 : i32
    return %arg1, %arg3, %c0_i32 : i32, i32, i32
  }
  func.func @transform_3(%arg0: i32, %arg1: i32, %arg2: i32, %arg3: i32) -> (i32, i32, i32) {
    %c0_i32 = arith.constant 0 : i32
    %c0_i32_0 = arith.constant 0 : i32
    return %arg1, %arg3, %c0_i32 : i32, i32, i32
  }
  func.func @transform_4(%arg0: i32, %arg1: i32, %arg2: i32, %arg3: i32) -> (i32, i32, i32) {
    %c0_i32 = arith.constant 0 : i32
    %c0_i32_0 = arith.constant 0 : i32
    %c0_i32_1 = arith.constant 0 : i32
    return %arg1, %c0_i32, %c0_i32_0 : i32, i32, i32
  }
  func.func @transform_5(%arg0: i32, %arg1: i32, %arg2: i32, %arg3: i32) -> (i32, i32, i32) {
    %c0_i32 = arith.constant 0 : i32
    %c0_i32_0 = arith.constant 0 : i32
    %c0_i32_1 = arith.constant 0 : i32
    return %arg1, %c0_i32, %c0_i32_0 : i32, i32, i32
  }
  func.func @transform_6(%arg0: i32, %arg1: i32, %arg2: i32, %arg3: i32) -> (i32, i32, i32) {
    %c0_i32 = arith.constant 0 : i32
    %c0_i32_0 = arith.constant 0 : i32
    %c0_i32_1 = arith.constant 0 : i32
    return %arg1, %c0_i32, %c0_i32_0 : i32, i32, i32
  }
  func.func @transform_7(%arg0: i32, %arg1: i32, %arg2: i32, %arg3: i32) -> (i32, i32, i32, i32) {
    %c0_i32 = arith.constant 0 : i32
    %c0_i32_0 = arith.constant 0 : i32
    return %arg0, %arg1, %arg2, %c0_i32 : i32, i32, i32, i32
  }
  func.func @transform_8(%arg0: i32, %arg1: i32, %arg2: i32, %arg3: i32) -> (i32, i32, i32, i32) {
    %c0_i32 = arith.constant 0 : i32
    %c0_i32_0 = arith.constant 0 : i32
    return %arg0, %arg1, %arg2, %c0_i32 : i32, i32, i32, i32
  }
  func.func @transform_9(%arg0: i32, %arg1: i32, %arg2: i32, %arg3: i32) -> (i32, i32, i32, i32) {
    %c0_i32 = arith.constant 0 : i32
    %c0_i32_0 = arith.constant 0 : i32
    return %arg0, %arg1, %arg2, %c0_i32 : i32, i32, i32, i32
  }
}

</mosaic_0001>

<bundles_post_ra>
// kernel: tpu_custom_call.1
= control target key start
LH: loop header
LB: loop body
LE: loop exit
PB: predicated region body
PF: predicated region fallthrough
CT: control target
= control target key end

     0   :  { %s1780_s0 = inlined_call_operand.vmem [shape: f32[2,8,32], index: 0, kind: input, shape index: {}]   ;;  %s1781_s1 = inlined_call_operand.vmem [shape: f32[4,32,8], index: 1, kind: input, shape index: {}]   ;;  %s1782_s2 = inlined_call_operand.vmem [shape: f32[4,32,8], index: 2, kind: input, shape index: {}]   ;;  %s1783_s3 = inlined_call_operand.vmem [shape: f32[4,32,8], index: 3, kind: input, shape index: {}]   ;;  %s1784_s4 = inlined_call_operand.vmem [shape: f32[4,1,8], index: 4, kind: input, shape index: {}]   ;;  %s1785_s5 = inlined_call_operand.vmem [shape: f32[4,1,8], index: 5, kind: input, shape index: {}]   ;;  %s1786_s6 = inlined_call_operand.vmem [shape: f32[4,1,8], index: 6, kind: input, shape index: {}]   ;;  %s1787_s7 = inlined_call_operand.hbm [shape: f32[2,4,8,8], index: 7, kind: output, shape index: {0}]   ;;  %s1788_s8 = inlined_call_operand.hbm [shape: f32[2,4,8,8], index: 8, kind: output, shape index: {1}]   ;;  %s1789_s9 = inlined_call_operand.hbm [shape: f32[2,4,8,8], index: 9, kind: output, shape index: {2}]  }
   0x1   :  { %1797 = sst [smem:[#allocation17_spill]] %s1780_s0 }
   0x2   :  { %1798 = sst [smem:[#allocation18_spill]] %s1781_s1 }
   0x3   :  { %1799 = sst [smem:[#allocation19_spill]] %s1782_s2 }
   0x4   :  { %1800 = sst [smem:[#allocation20_spill]] %s1783_s3 }
   0x5   :  { %15 = vsyncpa [#allocation6], 0 }
   0x6   :  { %17 = vsyncpa [#allocation6 + $0x1], 0 }
   0x7   :  { %18 = vsyncpa [#allocation8], 0 }
   0x8   :  { %20 = vsyncpa [#allocation8 + $0x1], 0  ;;  %s1523_s30 = smov 0   ;;  %s1525_s10 = smov 0  }
   0x9   :  { %s1527_s11 = smov 0   ;;  %s1529_s12 = smov 0  }
   0xa   :  { %s1531_s13 = smov 0   ;;  %s1533_s14 = smov 0  }
   0xb   :  { %s1535_s15 = smov 0   ;;  %s1537_s16 = smov 0  }
   0xc LB: > { %1801 = sst [smem:[#allocation12_spill]] %s1457_s14  ;;  %s1791_s17 = sadd.s32 4294967295, %s1465_s16   ;;  %s1465_s16 = sphi %s1537_s16, %s26_s16   ;;  %s1461_s15 = sphi %s1535_s15, %s1819_s15   ;;  %s1457_s14 = sphi %s1533_s14, %s1818_s14   ;;  %s1453_s13 = sphi %s1531_s13, %s1817_s13   ;;  %s1449_s12 = sphi %s1529_s12, %s1816_s12   ;;  %s1445_s11 = sphi %s1527_s11, %s1822_s11   ;;  %s1441_s10 = sphi %s1525_s10, %s1821_s10   ;;  %s1437_s30 = sphi %s1523_s30, %s1820_s30  }
   0xd   : > { %1802 = sst [smem:[#allocation13_spill]] %s1461_s15  ;;  %s1790_s18 = sadd.s32 4294967294, %s1465_s16  }
   0xe   : > { %s48_s19 = sadd.s32 1, %s1457_s14  ;;  %s52_s20 = sadd.s32 1, %s1461_s15 }
   0xf   : > { %p50_p0 = scmp.ge.s32.totalorder %s48_s19, 4  ;;  %p265_p1 = scmp.ne.s32.totalorder %s1445_s11, %s1441_s10 }
  0x10   : > { %p266_p2 = scmp.eq.s32.totalorder %s1791_s17, 7  ;;  %p271_p5 = scmp.ne.s32.totalorder %s1441_s10, %s1437_s30 }
  0x11   : > { %s1824_s19 = smov (%p50_p0, %s48_s19), 0  ;;  %s1826_s20 = smov (!%p50_p0, %s52_s20), %s1461_s15 }
  0x12   : > { %1803 = sst [smem:[#allocation14_spill]] %s1824_s19  ;;  %s249_s21 = ssub.s32 %s1457_s14, %s1824_s19 }
  0x13   : > { %p1576_p3 = por %p266_p2, %p265_p1  ;;  %p54_p4 = scmp.ge.s32.totalorder %s1826_s20, 2 }
  0x14   : > { %p272_p6 = scmp.eq.s32.totalorder %s1790_s18, 7  ;;  %p1130_p7 = scmp.ge.s32.totalorder %s1465_s16, 1 }
  0x15   : > { %s1828_s20 = smov (%p54_p4, %s1826_s20), 0  ;;  %p420_p9 = scmp.lt.s32.totalorder %s1465_s16, 9 }
  0x16   : > { %1805 = sst [smem:[#allocation15_spill]] %s1828_s20  ;;  %p1587_p8 = por %p272_p6, %p271_p5 }
  0x17   : > { %s248_s24 = ssub.s32 %s1461_s15, %s1828_s20  ;;  %s255_s25 = sadd.s32 1, %s1445_s11 }
  0x18   : > { %s250_s26 = sor.u32 %s249_s21, %s248_s24  ;;  %p421_p10 = pnand %p1130_p7, %p420_p9 }
  0x19   : > { %p253_p11 = scmp.eq.s32.totalorder %s250_s26, 0  ;;  %p518_p12 = scmp.lt.s32.totalorder (!%p421_p10), %s1449_s12, 3  ;;  %v1467_v0 = vmov (!%p421_p10), 0.0|0.0   ;;  %vm560_vm0 = vcmask (!%p421_p10), 64512   ;;  %vm1468_vm1 = vmmov (!%p421_p10), 0   ;;  %v1469_v1 = vmov (!%p421_p10), 0.0  }
  0x1a   : > { %424 = sbr.rel (%p421_p10) target bundleno = 333 (0x14d), region = 48  ;;  %p507_p13 = scmp.lt.s32.totalorder (!%p421_p10), %s1453_s13, 1  ;;  %1209 = vmatprep.subr.bf16.mxu0 (!%p421_p10), %v1467_v0  ;;  %1215 = vmatprep.subr.bf16.mxu1 (!%p421_p10), %v1467_v0  ;;  %561 = vst.msk [vmem:[#allocation2] sm:$0xff] (!%p421_p10), %vm560_vm0, %v1469_v1  ;;  %562 = vst.msk [vmem:[#allocation3] sm:$0xff] (!%p421_p10), %vm560_vm0, %v1469_v1  ;;  %vm570_vm2 = vcmask (!%p421_p10), 261120  }
  0x1b   : > { %s1596_s27 = scalar_select %p253_p11, %s1445_s11, %s255_s25  }
  0x1c   : > { %1184 = vmatprep.mubr.msk.f32.mxu0 (!%p421_p10), %vm1468_vm1, %v1469_v1  ;;  %1195 = vmatprep.mubr.msk.f32.mxu1 (!%p421_p10), %vm1468_vm1, %v1469_v1  ;;  %563 = vst.msk [vmem:[#allocation4] sm:$0xff] (!%p421_p10), %vm560_vm0, %v1469_v1  ;;  %s1808_s1 = sld [smem:[#allocation18_spill]] (!%p421_p10)  ;;  %s1809_s2 = sld [smem:[#allocation19_spill]] (!%p421_p10) }
  0x1d   : > { %1807 = sst [smem:[#allocation16_spill]] %s1596_s27  ;;  %s1810_s3 = sld [smem:[#allocation20_spill]] (!%p421_p10) }
  0x1e   : > { %s1811_s0 = sld [smem:[#allocation17_spill]] (!%p421_p10)  ;;  %s1150_s15 = sshll.u32 (!%p421_p10), %s1453_s13, 2 }
  0x1f   : > { %s857_s19 = sadd.s32 (!%p421_p10), %s1449_s12, %s1150_s15 }
  0x21   : > { %s1601_s28 = scalar_select %p518_p12, %s1449_s12, 3  ;;  %v565_v21 = vld [vmem:[#allocation2] sm:$0xff]  ;;  %v647_v22 = vld [vmem:[#allocation3] sm:$0xff] }
  0x22   : > { %s508_s29 = scalar_select %p507_p13, %s1453_s13, 1 }
  0x23   : > { %s1158_s21 = sshll.u32 %s1601_s28, 5  ;;  %v724_v29 = vld [vmem:[#allocation4] sm:$0xff]  ;;  %s552_s24 = scalar_lea.vmem %s1785_s5, %s1601_s28 }
  0x24   : > { %s525_s26 = scalar_lea.vmem %s1808_s1, %s1158_s21  ;;  %s535_s20 = scalar_lea.vmem %s1809_s2, %s1158_s21  ;;  %v1145_v34 = vld [vmem:[%s552_s24] ss:$0 sm:$0xff] }
  0x25   : > { %v566_v2 = vld [vmem:[%s525_s26] sm:$0xff]  ;;  %v567_v3 = vld [vmem:[%s525_s26 + $0x8] sm:$0xff]  ;;  %v568_v4 = vld [vmem:[%s525_s26 + $0x10] sm:$0xff]  ;;  %s545_s14 = scalar_lea.vmem %s1810_s3, %s1158_s21  ;;  %s1134_s27 = sshll.u32 %s508_s29, 3 }
  0x26   : > { %v1210_v5 = vpack.c.bf16 %v567_v3, %v566_v2  ;;  %v569_v6 = vld [vmem:[%s525_s26 + $0x18] sm:$0xff]  ;;  %v648_v7 = vld [vmem:[%s535_s20] sm:$0xff]  ;;  %v649_v8 = vld [vmem:[%s535_s20 + $0x8] sm:$0xff]  ;;  %s516_s17 = scalar_lea.vmem %s1811_s0, %s1134_s27  ;;  %s549_s29 = scalar_lea.vmem %s1784_s4, %s1601_s28 }
  0x27   : > { %v1216_v9 = vpack.c.bf16 %v649_v8, %v648_v7  ;;  %v1213_v10 = vpack.c.bf16 %v569_v6, %v568_v4  ;;  %v650_v11 = vld [vmem:[%s535_s20 + $0x10] sm:$0xff]  ;;  %v651_v12 = vld [vmem:[%s535_s20 + $0x18] sm:$0xff]  ;;  %v725_v13 = vld [vmem:[%s545_s14] sm:$0xff]  ;;  %s1812_s13 = sadd.s32 4294967295, %s1465_s16   ;;  %s1813_s27 = sand.u32 1, %s1441_s10  }
  0x28   : > { %1211 = vmatpush3.bf16.msra.mxu0 %v1210_v5  ;;  %v726_v14 = vld [vmem:[%s545_s14 + $0x8] sm:$0xff]  ;;  %v1219_v15 = vpack.c.bf16 %v651_v12, %v650_v11  ;;  %v564_v16 = vld [vmem:[%s516_s17] sm:$0xff]  ;;  %v727_v18 = vld [vmem:[%s545_s14 + $0x10] sm:$0xff]  ;;  %s1642_s25 = sand.u32 1, %s1812_s13   ;;  %s1644_s17 = sshll.u32 %s857_s19, 7 }
  0x29   : > { %1212 = vmatprep.subr.bf16.mxu0 %v1467_v0  ;;  %1217 = vmatpush3.bf16.msra.mxu1 %v1216_v9  ;;  %v1222_v17 = vpack.c.bf16 %v726_v14, %v725_v13  ;;  %v728_v19 = vld [vmem:[%s545_s14 + $0x18] sm:$0xff]  ;;  %s1796_s14 = sand.u32 1, %s1441_s10   ;;  %v1144_v31 = vld [vmem:[%s549_s29] ss:$0 sm:$0xff]  ;;  %s1653_s21 = scalar_lea.hbm %s1787_s7, %s1644_s17 }
  0x2a   : > { %1218 = vmatprep.subr.bf16.mxu1 %v1467_v0  ;;  %v1225_v20 = vpack.c.bf16 %v728_v19, %v727_v18  ;;  %s1629_s18 = sshll.u32 %s1796_s14, 3  ;;  %s1661_s24 = scalar_lea.hbm %s1788_s8, %s1644_s17 }
  0x2b   : > { %s492_s14 = scalar_lea.vmem [#allocation5], %s1629_s18  ;;  %s499_s15 = scalar_lea.vmem [#allocation7], %s1629_s18 }
  0x2c   : > { %1214 = vmatpush3.bf16.msra.mxu0 %v1213_v10  ;;  %s861_s12 = sshll.u32 %s492_s14, 4  ;;  %s877_s20 = sshll.u32 %s499_s15, 4  ;;  %s1655_s12 = int_to_ptr.vmem [resolvable:$true] %s861_s12  ;;  %s1663_s20 = int_to_ptr.vmem [resolvable:$true] %s877_s20 }
  0x2d   : > { %1221 = vmatprep.subr.bf16.mxu0 %v1467_v0  ;;  %1220 = vmatpush3.bf16.msra.mxu1 %v1219_v15  ;;  %s555_s19 = scalar_lea.vmem %s1786_s6, %s1601_s28  ;;  %s835_s1 = scalar_lea.sflag [#allocation6], %s1813_s27 }
  0x2e   : > { %s1311_s2 = scalar_lea.vmem %s1655_s12, 128  ;;  %s1470_s29 = smov [#allocation5]  }
  0x2f   : > { %1185 = vmatmul.mubr.msk.f32.vlgmr.msra.gmra.mrb[0].mxu0 %vm570_vm2, %v564_v16  ;;  %p1312_p0 = scmp.ne.s32.totalorder %s1655_s12, %s1311_s2  ;;  %s1315_s26 = sshll.u32 %s1470_s29, 4  ;;  %s1316_s26 = int_to_ptr.vmem [resolvable:$false] %s1315_s26 }
  0x30   : > { %1223 = vmatpush3.bf16.msra.mxu0 %v1222_v17  ;;  %1196 = vmatmul.mubr.msk.f32.vlgmr.msra.gmra.mrb[0].mxu1 %vm570_vm2, %v564_v16  ;;  %s1317_s3 = scalar_lea.vmem %s1316_s26, 256  ;;  %p1318_p4 = scmp.lt.s32.totalorder %s1655_s12, %s1316_s26 }
  0x31   : > { %1224 = vmatprep.subr.bf16.mxu0 %v1467_v0  ;;  %1206 = vmatprep.mubr.msk.f32.mxu0 %vm1468_vm1, %v1469_v1  ;;  %p1313_p1 = pnand %p1312_p0, %p1576_p3  ;;  %p1319_p5 = scmp.lt.s32.totalorder %s1317_s3, %s1311_s2 }
  0x33   : > { %p1314_p2 = pneg %p1313_p1  ;;  %p1320_p6 = por %p1319_p5, %p1318_p4 }
  0x34   : > { %1226 = vmatpush3.bf16.msra.mxu0 %v1225_v20 }
  0x35   : > { %p1321_p7 = pnand %p1320_p6, %p1314_p2 }
  0x37   : > { %1207 = vmatmul.mubr.msk.f32.vlgmr.msra.gmra.mrb[2].mxu0 %vm570_vm2, %v564_v16 }
 0x102   : > { %v640_v23 = vpop.f32.mrb[0].mxu0 }
 0x103   : > { %v644_v24 = vadd.f32 %v640_v23, %v565_v21  ;;  %v1186_v25 = vpop.f32.mrb[1].mxu0  ;;  %v718_v26 = vpop.f32.mrb[0].mxu1 }
 0x104   : > { %v722_v27 = vadd.f32 %v718_v26, %v647_v22  ;;  %v1197_v28 = vpop.f32.mrb[1].mxu1 }
 0x105   : > { %646 = vst.msk [vmem:[#allocation2] sm:$0xff] %vm560_vm0, %v644_v24 }
 0x106   : > { %723 = vst.msk [vmem:[#allocation3] sm:$0xff] %vm560_vm0, %v722_v27 }
 0x10a   : > { %v795_v30 = vpop.f32.mrb[2].mxu0 }
 0x10b   : > { %v799_v32 = vadd.f32 %v795_v30, %v724_v29  ;;  %v1208_v33 = vpop.f32.mrb[3].mxu0 }
 0x10c   : > { %v804_v35 = vld [vmem:[#allocation2] sm:$0xff] }
 0x10d   : > { %800 = vst.msk [vmem:[#allocation4] sm:$0xff] %vm560_vm0, %v799_v32  ;;  %v814_v36 = vld [vmem:[#allocation3] sm:$0xff]  ;;  %v812_v37 = vadd.f32 %v1144_v31, %v804_v35 }
 0x10e   : > { %v822_v38 = vadd.f32 %v1145_v34, %v814_v36 }
 0x10f   : > { %813 = vst.msk [vmem:[%s492_s14] sm:$0xff] %vm560_vm0, %v812_v37 }
 0x110   : > { %823 = vst.msk [vmem:[%s499_s15] sm:$0xff] %vm560_vm0, %v822_v38 }
 0x111   : > { %1324 = shalt.err (!%p1321_p7)
}
 0x112   : > { %s1325_s0 = scalar_lea.hbm %s1653_s21, 128  ;;  %s1329_s13 = scalar_lea.hbm %s1787_s7, 1024 }
 0x113   : > { %p1326_p9 = scmp.ne.s32.totalorder %s1653_s21, %s1325_s0  ;;  %p1330_p12 = scmp.lt.u32.totalorder %s1653_s21, %s1787_s7 }
 0x114   : > { %p1331_p13 = scmp.lt.u32.totalorder %s1329_s13, %s1325_s0  ;;  %p1333_p1 = scmp.lt.u32.totalorder %s1325_s0, %s1653_s21 }
 0x115   : > { %p1327_p10 = pnand %p1326_p9, %p1576_p3 }
 0x116   : > { %p1332_p0 = por %p1331_p13, %p1330_p12 }
 0x117   : > { %p1328_p11 = pneg %p1327_p10 }
 0x118   : > { %p1334_p2 = por %p1333_p1, %p1332_p0 }
 0x11a   : > { %p1335_p4 = pnand %p1334_p2, %p1328_p11 }
 0x11c   : > { %1338 = shalt.err (!%p1335_p4)
}
 0x11d   : > { %1227 = dma.vmem_to_hbm [thread:$0]  (%p1576_p3), %s1655_s12, 128, %s1653_s21, %s835_s1  }
 0x11e   : > { %s840_s2 = scalar_lea.sflag [#allocation8], %s1642_s25  ;;  %s1339_s3 = scalar_lea.vmem %s1663_s20, 128 }
 0x11f   : > { %p1340_p5 = scmp.ne.s32.totalorder %s1663_s20, %s1339_s3  ;;  %s1471_s26 = smov [#allocation7]  }
 0x120   : > { %s1343_s0 = sshll.u32 %s1471_s26, 4  ;;  %s1344_s0 = int_to_ptr.vmem [resolvable:$false] %s1343_s0 }
 0x121   : > { %p1341_p6 = pnand %p1340_p5, %p1576_p3  ;;  %s1345_s14 = scalar_lea.vmem %s1344_s0, 256 }
 0x122   : > { %p1346_p9 = scmp.lt.s32.totalorder %s1663_s20, %s1344_s0  ;;  %p1347_p10 = scmp.lt.s32.totalorder %s1345_s14, %s1339_s3 }
 0x123   : > { %p1342_p7 = pneg %p1341_p6 }
 0x124   : > { %p1348_p11 = por %p1347_p10, %p1346_p9 }
 0x126   : > { %p1349_p12 = pnand %p1348_p11, %p1342_p7 }
 0x128   : > { %1352 = shalt.err (!%p1349_p12)
}
 0x129   : > { %s1353_s1 = scalar_lea.hbm %s1661_s24, 128  ;;  %s1357_s15 = scalar_lea.hbm %s1788_s8, 1024 }
 0x12a   : > { %p1354_p13 = scmp.ne.s32.totalorder %s1661_s24, %s1353_s1  ;;  %p1358_p2 = scmp.lt.u32.totalorder %s1661_s24, %s1788_s8 }
 0x12b   : > { %p1359_p4 = scmp.lt.u32.totalorder %s1357_s15, %s1353_s1  ;;  %p1361_p6 = scmp.lt.u32.totalorder %s1353_s1, %s1661_s24 }
 0x12c   : > { %p1355_p0 = pnand %p1354_p13, %p1576_p3 }
 0x12d   : > { %p1360_p5 = por %p1359_p4, %p1358_p2 }
 0x12e   : > { %p1356_p1 = pneg %p1355_p0 }
 0x12f   : > { %p1362_p7 = por %p1361_p6, %p1360_p5 }
 0x131   : > { %p1363_p9 = pnand %p1362_p7, %p1356_p1 }
 0x133   : > { %1366 = shalt.err (!%p1363_p9)
}
 0x134   : > { %1228 = dma.vmem_to_hbm [thread:$0]  (%p1576_p3), %s1663_s20, 128, %s1661_s24, %s840_s2   ;;  %v1146_v39 = vld [vmem:[%s555_s19] ss:$0 sm:$0xff]  ;;  %v824_v40 = vld [vmem:[#allocation4] sm:$0xff] }
 0x135   : > { %s506_s26 = scalar_lea.vmem [#allocation9], %s1629_s18  ;;  %v832_v41 = vadd.f32 %v1146_v39, %v824_v40  ;;  %s1728_s12 = scalar_lea.hbm %s1789_s9, %s1644_s17 }
 0x136   : > { %s893_s0 = sshll.u32 %s506_s26, 4  ;;  %s1472_s20 = smov [#allocation9]   ;;  %s894_s0 = int_to_ptr.vmem [resolvable:$true] %s893_s0 }
 0x137   : > { %833 = vst.msk [vmem:[%s506_s26] sm:$0xff] %vm560_vm0, %v832_v41  ;;  %s1367_s21 = scalar_lea.vmem %s894_s0, 128  ;;  %s1371_s28 = sshll.u32 %s1472_s20, 4  ;;  %s1372_s28 = int_to_ptr.vmem [resolvable:$false] %s1371_s28 }
 0x138   : > { %p1368_p10 = scmp.ne.s32.totalorder %s894_s0, %s1367_s21  ;;  %s1373_s18 = scalar_lea.vmem %s1372_s28, 256 }
 0x139   : > { %p1374_p13 = scmp.lt.s32.totalorder %s894_s0, %s1372_s28  ;;  %p1375_p0 = scmp.lt.s32.totalorder %s1373_s18, %s1367_s21 }
 0x13a   : > { %p1369_p11 = pnand %p1368_p10, %p1576_p3 }
 0x13b   : > { %p1376_p1 = por %p1375_p0, %p1374_p13 }
 0x13c   : > { %p1370_p12 = pneg %p1369_p11 }
 0x13e   : > { %p1377_p2 = pnand %p1376_p1, %p1370_p12 }
 0x140   : > { %1380 = shalt.err (!%p1377_p2)
}
 0x141   : > { %s1381_s17 = scalar_lea.hbm %s1728_s12, 128  ;;  %s1385_s15 = scalar_lea.hbm %s1789_s9, 1024 }
 0x142   : > { %p1382_p4 = scmp.ne.s32.totalorder %s1728_s12, %s1381_s17  ;;  %p1386_p7 = scmp.lt.u32.totalorder %s1728_s12, %s1789_s9 }
 0x143   : > { %p1387_p9 = scmp.lt.u32.totalorder %s1385_s15, %s1381_s17  ;;  %p1389_p11 = scmp.lt.u32.totalorder %s1381_s17, %s1728_s12 }
 0x144   : > { %p1383_p5 = pnand %p1382_p4, %p1576_p3 }
 0x145   : > { %p1388_p10 = por %p1387_p9, %p1386_p7 }
 0x146   : > { %p1384_p6 = pneg %p1383_p5 }
 0x147   : > { %p1390_p12 = por %p1389_p11, %p1388_p10 }
 0x149   : > { %p1391_p13 = pnand %p1390_p12, %p1384_p6 }
 0x14b   : > { %1394 = shalt.err (!%p1391_p13)
}
 0x14c   : > { %1229 = dma.vmem_to_hbm [thread:$0]  (%p1576_p3), %s894_s0, 128, %s1728_s12, %s840_s2  }
 0x14d PF: > { %p1243_p0 = scmp.ge.s32.totalorder %s1465_s16, 2  ;;  %s905_s29 = sand.u32 1, %s1437_s30  }
 0x14e   : > { %s906_s3 = scalar_lea.sflag [#allocation6], %s905_s29 }
 0x14f   : > { %p1234_p1 = pnand %p1243_p0, %p1587_p8 }
 0x151   : > { %1428 = dma.done.wait (!%p1234_p1), %s906_s3, 128  }
 0x152   : > { %1430 = vsyncadd (!%p1234_p1), %s906_s3, 4294967168  ;;  %s1814_s26 = sadd.s32 4294967294, %s1465_s16  }
 0x153   : > { %s914_s14 = sand.u32 1, %s1814_s26  }
 0x154   : > { %s915_s1 = scalar_lea.sflag [#allocation8], %s914_s14 }
 0x155   : > { %1432 = dma.done.wait (!%p1234_p1), %s915_s1, 256  }
 0x156   : > { %1434 = vsyncadd (!%p1234_p1), %s915_s1, 4294967040  ;;  %s26_s16 = sadd.s32 1, %s1465_s16   ;;  %s1815_s22 = sld [smem:[#allocation16_spill]] }
 0x157   : > { %p23_p3 = scmp.ge.s32.totalorder %s26_s16, 10   ;;  %s1816_s12 = sld [smem:[#allocation12_spill]] }
 0x158   : > { %s1817_s13 = sld [smem:[#allocation13_spill]]  ;;  %s1818_s14 = sld [smem:[#allocation14_spill]] }
 0x159   : > { %s1819_s15 = sld [smem:[#allocation15_spill]]  ;;  %s1820_s30 = smov %s1441_s10 }
 0x15a   : > { %s1821_s10 = smov %s1445_s11  ;;  %25 = sbr.rel (!%p23_p3) target bundleno = 12 (0xc), region = 141 }
 0x15c   : > { %s1822_s11 = smov %s1815_s22 }
 0x161   :  { %929 = vsyncpa [#allocation6], 1 }
 0x162   :  { %931 = vsyncpa [#allocation6 + $0x1], 1 }
 0x163   :  { %932 = vsyncpa [#allocation8], 1 }
 0x164   :  { %934 = vsyncpa [#allocation8 + $0x1], 1 }

</bundles_post_ra>
